<compile_context>
chip_gen: v7x
topology: tpu7x:2x2x1
jax: 0.10.0
libtpu: 0.0.40
codegen_flags: <defaults>
</compile_context>

<pallas_src>
import functools

import jax
import jax.numpy as jnp
from jax.experimental import pallas as pl
from jax.experimental.pallas import tpu as pltpu


# One-line lever for v6e / v7x: set to jnp.bfloat16 to feed the MXU bf16
# operands (accumulation stays f32).  Keep f32 for v5e / strict validation.
MXU_OPERAND_DTYPE = jnp.float32


# ----------------------------------------------------------------------------
# Fused Pallas kernel: sharing stack -> packed expert stack -> batched gate
# softmax + mixture -> packed task stack.  Every intermediate stays in
# VMEM / vregs; one output store of a lane-dense (bt, T*out_dim) slab.
# ----------------------------------------------------------------------------
def _fused_mmoe_kernel(*refs, n_share, n_exp, n_task,
                       num_experts, num_tasks, expert_dim, mxu_dtype):
    o_ref = refs[-1]
    idx = 0

    def mm(a, w):
        # MXU matmul with f32 accumulation; operands optionally bf16.
        return jnp.dot(a.astype(mxu_dtype), w.astype(mxu_dtype),
                       preferred_element_type=jnp.float32)

    # ---- sharing DNN (dense + relu stack) -----------------------------------
    h = refs[idx][...]                                        # (bt, in)
    idx += 1
    for _ in range(n_share):
        w = refs[idx][...]
        b = refs[idx + 1][...]
        idx += 2
        h = jnp.maximum(mm(h, w) + b, 0.0)
    shared = h                                                # (bt, S)

    # ---- expert towers: lane-concatenated / block-diagonal packed weights ---
    e_act = shared
    for _ in range(n_exp):
        w = refs[idx][...]                                    # (din, E*dout) / (E*din, E*dout)
        b = refs[idx + 1][...]                                # (1, E*dout)
        idx += 2
        e_act = jnp.maximum(mm(e_act, w) + b, 0.0)
    experts = e_act                                           # (bt, E*D)

    # ---- gates: single matmul -> (bt, T*E); per-task softmax + mixture ------
    gate_w = refs[idx][...]                                   # (S, T*E)
    idx += 1
    logits = mm(shared, gate_w)                               # (bt, T*E)

    E, D = num_experts, expert_dim
    mixed_blocks = []
    for t in range(num_tasks):
        lt = logits[:, t * E:(t + 1) * E]                     # (bt, E)
        lt = lt - jnp.max(lt, axis=-1, keepdims=True)
        p = jnp.exp(lt)
        # exact division (review: approx reciprocal bought nothing, cost accuracy)
        g = p / jnp.sum(p, axis=-1, keepdims=True)            # (bt, E)
        acc = g[:, 0:1] * experts[:, 0:D]
        for e in range(1, E):
            acc = acc + g[:, e:e + 1] * experts[:, e * D:(e + 1) * D]
        mixed_blocks.append(acc)                              # (bt, D)
    t_act = jnp.concatenate(mixed_blocks, axis=-1)            # (bt, T*D)

    # ---- task towers: block-diagonal packed weights --------------------------
    for _ in range(n_task):
        w = refs[idx][...]                                    # (T*din, T*dout)
        b = refs[idx + 1][...]                                # (1, T*dout)
        idx += 2
        t_act = jnp.maximum(mm(t_act, w) + b, 0.0)

    o_ref[...] = t_act.astype(o_ref.dtype)                    # (bt, T*out_dim)


# ----------------------------------------------------------------------------
# Parameter init (natural, per-expert / per-task layout) and one-time packing
# into the lane-dense layout the kernel consumes.
# ----------------------------------------------------------------------------
def init_params(key, in_shape, sharing_units, experts_units, task_units):
    assert all(tuple(u) == tuple(experts_units[0]) for u in experts_units), \
        "fused kernel requires identical expert tower architectures"
    assert all(tuple(u) == tuple(task_units[0]) for u in task_units), \
        "fused kernel requires identical task tower architectures"

    params = {}
    # sharing DNN
    sharing = []
    d = in_shape
    for u in sharing_units:
        key, k = jax.random.split(key)
        sharing.append((jax.random.normal(k, (d, u), jnp.float32) * 0.1,
                        jnp.zeros((1, u), jnp.float32)))
        d = u
    params["sharing"] = sharing
    shared_dim = d

    # expert towers (stacked over experts per layer)
    E = len(experts_units)
    ew, eb = [], []
    d = shared_dim
    for u in experts_units[0]:
        key, k = jax.random.split(key)
        ew.append(jax.random.normal(k, (E, d, u), jnp.float32) * 0.1)
        eb.append(jnp.zeros((E, 1, u), jnp.float32))
        d = u
    params["expert_w"], params["expert_b"] = ew, eb
    expert_dim = d

    # task towers (stacked over tasks per layer)
    T = len(task_units)
    tw, tb = [], []
    d = expert_dim
    for u in task_units[0]:
        key, k = jax.random.split(key)
        tw.append(jax.random.normal(k, (T, d, u), jnp.float32) * 0.1)
        tb.append(jnp.zeros((T, 1, u), jnp.float32))
        d = u
    params["task_w"], params["task_b"] = tw, tb

    # gate kernels (num_tasks, shared_dim, num_experts); MMoE gate has no bias
    key, k = jax.random.split(key)
    params["gate_w"] = jax.random.normal(
        k, (T, shared_dim, E), jnp.float32) * 0.1
    return params


def _block_diag(w_stack):
    """(N, din, dout) -> block-diagonal (N*din, N*dout)."""
    n, din, dout = w_stack.shape
    out = jnp.zeros((n * din, n * dout), w_stack.dtype)
    for i in range(n):
        out = out.at[i * din:(i + 1) * din, i * dout:(i + 1) * dout].set(w_stack[i])
    return out


def pack_params(params):
    """One-time host-side packing: everything the kernel sees is a 2-D array.
    Column layout is expert-major (e0 block | e1 block | ...) for expert
    activations and task-major for task activations."""
    E = params["expert_w"][0].shape[0]
    T = params["task_w"][0].shape[0]
    expert_dim = params["expert_w"][-1].shape[-1]
    out_dim = params["task_w"][-1].shape[-1]

    flat = []
    for w, b in params["sharing"]:
        flat += [w, b]

    for li, (w, b) in enumerate(zip(params["expert_w"], params["expert_b"])):
        e, din, dout = w.shape
        b_cat = b.reshape(1, e * dout)                       # (1, E*dout)
        if li == 0:
            # layer 0: lane-concat over experts -> (din, E*dout)
            w_p = jnp.transpose(w, (1, 0, 2)).reshape(din, e * dout)
        else:
            # deeper layers: block-diagonal -> (E*din, E*dout)
            w_p = _block_diag(w)
        flat += [w_p, b_cat]

    # gate (T, S, E) -> (S, T*E) so a single matmul yields all task logits
    gw = params["gate_w"]
    t_, s_, e_ = gw.shape
    flat.append(jnp.transpose(gw, (1, 0, 2)).reshape(s_, t_ * e_))

    for w, b in zip(params["task_w"], params["task_b"]):
        t__, din, dout = w.shape
        flat += [_block_diag(w), b.reshape(1, t__ * dout)]

    cfg = dict(n_share=len(params["sharing"]),
               n_exp=len(params["expert_w"]),
               n_task=len(params["task_w"]),
               num_experts=E, num_tasks=T,
               expert_dim=expert_dim, out_dim=out_dim)
    return {"flat": flat, "cfg": cfg}


# ----------------------------------------------------------------------------
# Forward wrapper
# ----------------------------------------------------------------------------
def general_mmoe_forward(packed, x):
    """Mirrors GeneralMMoEModel.forward: returns a list of (B, out_dim) arrays."""
    flat, cfg = packed["flat"], packed["cfg"]
    T, out_dim = cfg["num_tasks"], cfg["out_dim"]
    B = x.shape[0]

    # Batch tile: full batch when small; 128-row tiles once scaled.  On v7x
    # (2 TCs, 64 MiB VMEM) keep tiles roughly half of what fits v5e/v6e.
    bt = B if B <= 128 else 128
    assert B % bt == 0, "batch must be divisible by the batch tile"
    grid = (B // bt,)

    args = [x]
    in_specs = [pl.BlockSpec((bt, x.shape[1]), lambda i: (i, 0))]
    for a in flat:
        args.append(a)
        # Weights / biases: full-array blocks, constant index map -> resident
        # across grid steps (no re-DMA per batch tile).
        in_specs.append(pl.BlockSpec(a.shape, lambda i: (0, 0)))

    kernel = functools.partial(
        _fused_mmoe_kernel,
        n_share=cfg["n_share"], n_exp=cfg["n_exp"], n_task=cfg["n_task"],
        num_experts=cfg["num_experts"], num_tasks=cfg["num_tasks"],
        expert_dim=cfg["expert_dim"], mxu_dtype=MXU_OPERAND_DTYPE)

    out = pl.pallas_call(
        kernel,
        grid=grid,
        in_specs=in_specs,
        out_specs=pl.BlockSpec((bt, T * out_dim), lambda i: (i, 0)),
        out_shape=jax.ShapeDtypeStruct((B, T * out_dim), jnp.float32),
        compiler_params=pltpu.CompilerParams(
            dimension_semantics=("parallel",)),
    )(*args)

    # per-task views (matches the module's list-of-tensors return)
    return [out[:, t * out_dim:(t + 1) * out_dim] for t in range(T)]


# ----------------------------------------------------------------------------
# Pure-JAX reference (for correctness checking)
# ----------------------------------------------------------------------------
def _reference_forward(params, x):
    h = x
    for w, b in params["sharing"]:
        h = jax.nn.relu(h @ w + b)
    shared = h
    E = params["expert_w"][0].shape[0]
    T = params["task_w"][0].shape[0]
    experts = []
    for e in range(E):
        a = shared
        for w, b in zip(params["expert_w"], params["expert_b"]):
            a = jax.nn.relu(a @ w[e] + b[e])
        experts.append(a)
    experts = jnp.stack(experts, axis=0)                            # (E, B, D)
    outs = []
    for t in range(T):
        gate = jax.nn.softmax(shared @ params["gate_w"][t], axis=-1)  # (B, E)
        mixed = jnp.einsum('be,ebd->bd', gate, experts)
        a = mixed
        for w, b in zip(params["task_w"], params["task_b"]):
            a = jax.nn.relu(a @ w[t] + b[t])
        outs.append(a)
    return outs


# ----------------------------------------------------------------------------
if __name__ == "__main__":
    batch = 8
    in_shape = 32
    sharing_hidden_units = [64, 32]
    experts_hidden_units = [[32, 16], [32, 16], [32, 16]]   # 3 experts, expert_dim=16
    task_hidden_units = [[16, 8], [16, 8]]                  # 2 tasks, out_dim=8

    key = jax.random.PRNGKey(0)
    key, kx, kp = jax.random.split(key, 3)
    x = jax.random.normal(kx, (batch, in_shape), jnp.float32)
    params = init_params(kp, in_shape, sharing_hidden_units,
                         experts_hidden_units, task_hidden_units)
    packed = pack_params(params)   # one-time host-side packing (hoisted)

    outs = general_mmoe_forward(packed, x)
    outs = [jax.block_until_ready(o) for o in outs]

    refs = _reference_forward(params, x)
    assert len(outs) == len(task_hidden_units)
    for o, r, units in zip(outs, refs, task_hidden_units):
        assert o.shape == (batch, units[-1])
        assert jnp.all(jnp.isfinite(o))
        # exact softmax (no approx reciprocal), f32 everywhere -> tight tolerance
        assert jnp.allclose(o, r, rtol=1e-4, atol=1e-5)
    print("KERNEL_OK")
</pallas_src>

<mosaic_0001>
module attributes {stable_mosaic.version = 11 : i64} {
  func.func @_fused_mmoe_kernel(%arg0: i32, %arg1: memref<8x32xf32, #tpu.memory_space<vmem>>, %arg2: memref<32x64xf32, #tpu.memory_space<vmem>>, %arg3: memref<1x64xf32, #tpu.memory_space<vmem>>, %arg4: memref<64x32xf32, #tpu.memory_space<vmem>>, %arg5: memref<1x32xf32, #tpu.memory_space<vmem>>, %arg6: memref<32x96xf32, #tpu.memory_space<vmem>>, %arg7: memref<1x96xf32, #tpu.memory_space<vmem>>, %arg8: memref<96x48xf32, #tpu.memory_space<vmem>>, %arg9: memref<1x48xf32, #tpu.memory_space<vmem>>, %arg10: memref<32x6xf32, #tpu.memory_space<vmem>>, %arg11: memref<32x32xf32, #tpu.memory_space<vmem>>, %arg12: memref<1x32xf32, #tpu.memory_space<vmem>>, %arg13: memref<32x16xf32, #tpu.memory_space<vmem>>, %arg14: memref<1x16xf32, #tpu.memory_space<vmem>>, %arg15: memref<8x16xf32, #tpu.memory_space<vmem>>) attributes {dimension_semantics = [#tpu.dimension_semantics<parallel>], iteration_bounds = array<i64: 1>, scalar_prefetch = 0 : i64, scratch_operands = 0 : i64, tpu.core_type = #tpu.core_type<tc>, window_params = [{transform_indices = @transform_0, window_bounds = array<i64: 8, 32>}, {pipeline_mode = #tpu.pipeline_mode<synchronous>, transform_indices = @transform_1, window_bounds = array<i64: 32, 64>}, {pipeline_mode = #tpu.pipeline_mode<synchronous>, transform_indices = @transform_2, window_bounds = array<i64: 1, 64>}, {pipeline_mode = #tpu.pipeline_mode<synchronous>, transform_indices = @transform_3, window_bounds = array<i64: 64, 32>}, {pipeline_mode = #tpu.pipeline_mode<synchronous>, transform_indices = @transform_4, window_bounds = array<i64: 1, 32>}, {pipeline_mode = #tpu.pipeline_mode<synchronous>, transform_indices = @transform_5, window_bounds = array<i64: 32, 96>}, {pipeline_mode = #tpu.pipeline_mode<synchronous>, transform_indices = @transform_6, window_bounds = array<i64: 1, 96>}, {pipeline_mode = #tpu.pipeline_mode<synchronous>, transform_indices = @transform_7, window_bounds = array<i64: 96, 48>}, {pipeline_mode = #tpu.pipeline_mode<synchronous>, transform_indices = @transform_8, window_bounds = array<i64: 1, 48>}, {pipeline_mode = #tpu.pipeline_mode<synchronous>, transform_indices = @transform_9, window_bounds = array<i64: 32, 6>}, {pipeline_mode = #tpu.pipeline_mode<synchronous>, transform_indices = @transform_10, window_bounds = array<i64: 32, 32>}, {pipeline_mode = #tpu.pipeline_mode<synchronous>, transform_indices = @transform_11, window_bounds = array<i64: 1, 32>}, {pipeline_mode = #tpu.pipeline_mode<synchronous>, transform_indices = @transform_12, window_bounds = array<i64: 32, 16>}, {pipeline_mode = #tpu.pipeline_mode<synchronous>, transform_indices = @transform_13, window_bounds = array<i64: 1, 16>}, {transform_indices = @transform_14, window_bounds = array<i64: 8, 16>}]} {
    %c0 = arith.constant 0 : index
    %c0_0 = arith.constant 0 : index
    %0 = vector.load %arg1[%c0, %c0_0] : memref<8x32xf32, #tpu.memory_space<vmem>>, vector<8x32xf32>
    %c0_1 = arith.constant 0 : index
    %c0_2 = arith.constant 0 : index
    %1 = vector.load %arg2[%c0_1, %c0_2] : memref<32x64xf32, #tpu.memory_space<vmem>>, vector<32x64xf32>
    %c0_3 = arith.constant 0 : index
    %c0_4 = arith.constant 0 : index
    %2 = vector.load %arg3[%c0_3, %c0_4] : memref<1x64xf32, #tpu.memory_space<vmem>>, vector<1x64xf32>
    %cst = arith.constant dense<0.000000e+00> : vector<8x64xf32>
    %3 = tpu.matmul %0, %1, %cst {dimension_numbers = #tpu.dot_dimension_numbers<[1], [0], [0], [1], [0, 0, 1, 1], [], []>} : vector<8x32xf32>, vector<32x64xf32>, vector<8x64xf32> -> vector<8x64xf32>
    %4 = vector.broadcast %2 : vector<1x64xf32> to vector<8x64xf32>
    %5 = arith.addf %3, %4 : vector<8x64xf32>
    %cst_5 = arith.constant 0.000000e+00 : f32
    %6 = vector.broadcast %cst_5 : f32 to vector<8x64xf32>
    %7 = arith.maximumf %5, %6 : vector<8x64xf32>
    %c0_6 = arith.constant 0 : index
    %c0_7 = arith.constant 0 : index
    %8 = vector.load %arg4[%c0_6, %c0_7] : memref<64x32xf32, #tpu.memory_space<vmem>>, vector<64x32xf32>
    %c0_8 = arith.constant 0 : index
    %c0_9 = arith.constant 0 : index
    %9 = vector.load %arg5[%c0_8, %c0_9] : memref<1x32xf32, #tpu.memory_space<vmem>>, vector<1x32xf32>
    %cst_10 = arith.constant dense<0.000000e+00> : vector<8x32xf32>
    %10 = tpu.matmul %7, %8, %cst_10 {dimension_numbers = #tpu.dot_dimension_numbers<[1], [0], [0], [1], [0, 0, 1, 1], [], []>} : vector<8x64xf32>, vector<64x32xf32>, vector<8x32xf32> -> vector<8x32xf32>
    %11 = vector.broadcast %9 : vector<1x32xf32> to vector<8x32xf32>
    %12 = arith.addf %10, %11 : vector<8x32xf32>
    %cst_11 = arith.constant 0.000000e+00 : f32
    %13 = vector.broadcast %cst_11 : f32 to vector<8x32xf32>
    %14 = arith.maximumf %12, %13 : vector<8x32xf32>
    %c0_12 = arith.constant 0 : index
    %c0_13 = arith.constant 0 : index
    %15 = vector.load %arg6[%c0_12, %c0_13] : memref<32x96xf32, #tpu.memory_space<vmem>>, vector<32x96xf32>
    %c0_14 = arith.constant 0 : index
    %c0_15 = arith.constant 0 : index
    %16 = vector.load %arg7[%c0_14, %c0_15] : memref<1x96xf32, #tpu.memory_space<vmem>>, vector<1x96xf32>
    %cst_16 = arith.constant dense<0.000000e+00> : vector<8x96xf32>
    %17 = tpu.matmul %14, %15, %cst_16 {dimension_numbers = #tpu.dot_dimension_numbers<[1], [0], [0], [1], [0, 0, 1, 1], [], []>} : vector<8x32xf32>, vector<32x96xf32>, vector<8x96xf32> -> vector<8x96xf32>
    %18 = vector.broadcast %16 : vector<1x96xf32> to vector<8x96xf32>
    %19 = arith.addf %17, %18 : vector<8x96xf32>
    %cst_17 = arith.constant 0.000000e+00 : f32
    %20 = vector.broadcast %cst_17 : f32 to vector<8x96xf32>
    %21 = arith.maximumf %19, %20 : vector<8x96xf32>
    %c0_18 = arith.constant 0 : index
    %c0_19 = arith.constant 0 : index
    %22 = vector.load %arg8[%c0_18, %c0_19] : memref<96x48xf32, #tpu.memory_space<vmem>>, vector<96x48xf32>
    %c0_20 = arith.constant 0 : index
    %c0_21 = arith.constant 0 : index
    %23 = vector.load %arg9[%c0_20, %c0_21] : memref<1x48xf32, #tpu.memory_space<vmem>>, vector<1x48xf32>
    %cst_22 = arith.constant dense<0.000000e+00> : vector<8x48xf32>
    %24 = tpu.matmul %21, %22, %cst_22 {dimension_numbers = #tpu.dot_dimension_numbers<[1], [0], [0], [1], [0, 0, 1, 1], [], []>} : vector<8x96xf32>, vector<96x48xf32>, vector<8x48xf32> -> vector<8x48xf32>
    %25 = vector.broadcast %23 : vector<1x48xf32> to vector<8x48xf32>
    %26 = arith.addf %24, %25 : vector<8x48xf32>
    %cst_23 = arith.constant 0.000000e+00 : f32
    %27 = vector.broadcast %cst_23 : f32 to vector<8x48xf32>
    %28 = arith.maximumf %26, %27 : vector<8x48xf32>
    %c0_24 = arith.constant 0 : index
    %c0_25 = arith.constant 0 : index
    %29 = vector.load %arg10[%c0_24, %c0_25] : memref<32x6xf32, #tpu.memory_space<vmem>>, vector<32x6xf32>
    %cst_26 = arith.constant dense<0.000000e+00> : vector<8x6xf32>
    %30 = tpu.matmul %14, %29, %cst_26 {dimension_numbers = #tpu.dot_dimension_numbers<[1], [0], [0], [1], [0, 0, 1, 1], [], []>} : vector<8x32xf32>, vector<32x6xf32>, vector<8x6xf32> -> vector<8x6xf32>
    %31 = vector.extract_strided_slice %30 {offsets = [0, 0], sizes = [8, 3], strides = [1, 1]} : vector<8x6xf32> to vector<8x3xf32>
    %cst_27 = arith.constant dense<0xFF800000> : vector<8xf32>
    %32 = vector.multi_reduction <maximumf>, %31, %cst_27 [1] : vector<8x3xf32> to vector<8xf32>
    %33 = vector.shape_cast %32 : vector<8xf32> to vector<8x1xf32>
    %34 = vector.broadcast %33 : vector<8x1xf32> to vector<8x3xf32>
    %35 = arith.subf %31, %34 : vector<8x3xf32>
    %36 = math.exp %35 : vector<8x3xf32>
    %cst_28 = arith.constant dense<0.000000e+00> : vector<8xf32>
    %37 = vector.multi_reduction <add>, %36, %cst_28 [1] : vector<8x3xf32> to vector<8xf32>
    %38 = vector.shape_cast %37 : vector<8xf32> to vector<8x1xf32>
    %39 = vector.broadcast %38 : vector<8x1xf32> to vector<8x3xf32>
    %40 = arith.divf %36, %39 : vector<8x3xf32>
    %41 = vector.extract_strided_slice %40 {offsets = [0, 0], sizes = [8, 1], strides = [1, 1]} : vector<8x3xf32> to vector<8x1xf32>
    %42 = vector.extract_strided_slice %28 {offsets = [0, 0], sizes = [8, 16], strides = [1, 1]} : vector<8x48xf32> to vector<8x16xf32>
    %43 = vector.broadcast %41 : vector<8x1xf32> to vector<8x16xf32>
    %44 = arith.mulf %43, %42 : vector<8x16xf32>
    %45 = vector.extract_strided_slice %40 {offsets = [0, 1], sizes = [8, 1], strides = [1, 1]} : vector<8x3xf32> to vector<8x1xf32>
    %46 = vector.extract_strided_slice %28 {offsets = [0, 16], sizes = [8, 16], strides = [1, 1]} : vector<8x48xf32> to vector<8x16xf32>
    %47 = vector.broadcast %45 : vector<8x1xf32> to vector<8x16xf32>
    %48 = arith.mulf %47, %46 : vector<8x16xf32>
    %49 = arith.addf %44, %48 : vector<8x16xf32>
    %50 = vector.extract_strided_slice %40 {offsets = [0, 2], sizes = [8, 1], strides = [1, 1]} : vector<8x3xf32> to vector<8x1xf32>
    %51 = vector.extract_strided_slice %28 {offsets = [0, 32], sizes = [8, 16], strides = [1, 1]} : vector<8x48xf32> to vector<8x16xf32>
    %52 = vector.broadcast %50 : vector<8x1xf32> to vector<8x16xf32>
    %53 = arith.mulf %52, %51 : vector<8x16xf32>
    %54 = arith.addf %49, %53 : vector<8x16xf32>
    %55 = vector.extract_strided_slice %30 {offsets = [0, 3], sizes = [8, 3], strides = [1, 1]} : vector<8x6xf32> to vector<8x3xf32>
    %cst_29 = arith.constant dense<0xFF800000> : vector<8xf32>
    %56 = vector.multi_reduction <maximumf>, %55, %cst_29 [1] : vector<8x3xf32> to vector<8xf32>
    %57 = vector.shape_cast %56 : vector<8xf32> to vector<8x1xf32>
    %58 = vector.broadcast %57 : vector<8x1xf32> to vector<8x3xf32>
    %59 = arith.subf %55, %58 : vector<8x3xf32>
    %60 = math.exp %59 : vector<8x3xf32>
    %cst_30 = arith.constant dense<0.000000e+00> : vector<8xf32>
    %61 = vector.multi_reduction <add>, %60, %cst_30 [1] : vector<8x3xf32> to vector<8xf32>
    %62 = vector.shape_cast %61 : vector<8xf32> to vector<8x1xf32>
    %63 = vector.broadcast %62 : vector<8x1xf32> to vector<8x3xf32>
    %64 = arith.divf %60, %63 : vector<8x3xf32>
    %65 = vector.extract_strided_slice %64 {offsets = [0, 0], sizes = [8, 1], strides = [1, 1]} : vector<8x3xf32> to vector<8x1xf32>
    %66 = vector.extract_strided_slice %28 {offsets = [0, 0], sizes = [8, 16], strides = [1, 1]} : vector<8x48xf32> to vector<8x16xf32>
    %67 = vector.broadcast %65 : vector<8x1xf32> to vector<8x16xf32>
    %68 = arith.mulf %67, %66 : vector<8x16xf32>
    %69 = vector.extract_strided_slice %64 {offsets = [0, 1], sizes = [8, 1], strides = [1, 1]} : vector<8x3xf32> to vector<8x1xf32>
    %70 = vector.extract_strided_slice %28 {offsets = [0, 16], sizes = [8, 16], strides = [1, 1]} : vector<8x48xf32> to vector<8x16xf32>
    %71 = vector.broadcast %69 : vector<8x1xf32> to vector<8x16xf32>
    %72 = arith.mulf %71, %70 : vector<8x16xf32>
    %73 = arith.addf %68, %72 : vector<8x16xf32>
    %74 = vector.extract_strided_slice %64 {offsets = [0, 2], sizes = [8, 1], strides = [1, 1]} : vector<8x3xf32> to vector<8x1xf32>
    %75 = vector.extract_strided_slice %28 {offsets = [0, 32], sizes = [8, 16], strides = [1, 1]} : vector<8x48xf32> to vector<8x16xf32>
    %76 = vector.broadcast %74 : vector<8x1xf32> to vector<8x16xf32>
    %77 = arith.mulf %76, %75 : vector<8x16xf32>
    %78 = arith.addf %73, %77 : vector<8x16xf32>
    %79 = tpu.concatenate %54, %78 in 1 : vector<8x16xf32>, vector<8x16xf32> -> vector<8x32xf32>
    %c0_31 = arith.constant 0 : index
    %c0_32 = arith.constant 0 : index
    %80 = vector.load %arg11[%c0_31, %c0_32] : memref<32x32xf32, #tpu.memory_space<vmem>>, vector<32x32xf32>
    %c0_33 = arith.constant 0 : index
    %c0_34 = arith.constant 0 : index
    %81 = vector.load %arg12[%c0_33, %c0_34] : memref<1x32xf32, #tpu.memory_space<vmem>>, vector<1x32xf32>
    %cst_35 = arith.constant dense<0.000000e+00> : vector<8x32xf32>
    %82 = tpu.matmul %79, %80, %cst_35 {dimension_numbers = #tpu.dot_dimension_numbers<[1], [0], [0], [1], [0, 0, 1, 1], [], []>} : vector<8x32xf32>, vector<32x32xf32>, vector<8x32xf32> -> vector<8x32xf32>
    %83 = vector.broadcast %81 : vector<1x32xf32> to vector<8x32xf32>
    %84 = arith.addf %82, %83 : vector<8x32xf32>
    %cst_36 = arith.constant 0.000000e+00 : f32
    %85 = vector.broadcast %cst_36 : f32 to vector<8x32xf32>
    %86 = arith.maximumf %84, %85 : vector<8x32xf32>
    %c0_37 = arith.constant 0 : index
    %c0_38 = arith.constant 0 : index
    %87 = vector.load %arg13[%c0_37, %c0_38] : memref<32x16xf32, #tpu.memory_space<vmem>>, vector<32x16xf32>
    %c0_39 = arith.constant 0 : index
    %c0_40 = arith.constant 0 : index
    %88 = vector.load %arg14[%c0_39, %c0_40] : memref<1x16xf32, #tpu.memory_space<vmem>>, vector<1x16xf32>
    %cst_41 = arith.constant dense<0.000000e+00> : vector<8x16xf32>
    %89 = tpu.matmul %86, %87, %cst_41 {dimension_numbers = #tpu.dot_dimension_numbers<[1], [0], [0], [1], [0, 0, 1, 1], [], []>} : vector<8x32xf32>, vector<32x16xf32>, vector<8x16xf32> -> vector<8x16xf32>
    %90 = vector.broadcast %88 : vector<1x16xf32> to vector<8x16xf32>
    %91 = arith.addf %89, %90 : vector<8x16xf32>
    %cst_42 = arith.constant 0.000000e+00 : f32
    %92 = vector.broadcast %cst_42 : f32 to vector<8x16xf32>
    %93 = arith.maximumf %91, %92 : vector<8x16xf32>
    %c0_43 = arith.constant 0 : index
    %c0_44 = arith.constant 0 : index
    %94 = vector.load %arg15[%c0_43, %c0_44] : memref<8x16xf32, #tpu.memory_space<vmem>>, vector<8x16xf32>
    tpu.vector_store %arg15[%c0_43, %c0_44], %93 {strides = array<i32>} : memref<8x16xf32, #tpu.memory_space<vmem>>, vector<8x16xf32>,
    return
  }
  func.func @transform_0(%arg0: i32) -> (i32, i32) {
    %c0_i32 = arith.constant 0 : i32
    %c0_i32_0 = arith.constant 0 : i32
    return %arg0, %c0_i32 : i32, i32
  }
  func.func @transform_1(%arg0: i32) -> (i32, i32) {
    %c0_i32 = arith.constant 0 : i32
    %c0_i32_0 = arith.constant 0 : i32
    %c0_i32_1 = arith.constant 0 : i32
    return %c0_i32, %c0_i32_0 : i32, i32
  }
  func.func @transform_2(%arg0: i32) -> (i32, i32) {
    %c0_i32 = arith.constant 0 : i32
    %c0_i32_0 = arith.constant 0 : i32
    %c0_i32_1 = arith.constant 0 : i32
    return %c0_i32, %c0_i32_0 : i32, i32
  }
  func.func @transform_3(%arg0: i32) -> (i32, i32) {
    %c0_i32 = arith.constant 0 : i32
    %c0_i32_0 = arith.constant 0 : i32
    %c0_i32_1 = arith.constant 0 : i32
    return %c0_i32, %c0_i32_0 : i32, i32
  }
  func.func @transform_4(%arg0: i32) -> (i32, i32) {
    %c0_i32 = arith.constant 0 : i32
    %c0_i32_0 = arith.constant 0 : i32
    %c0_i32_1 = arith.constant 0 : i32
    return %c0_i32, %c0_i32_0 : i32, i32
  }
  func.func @transform_5(%arg0: i32) -> (i32, i32) {
    %c0_i32 = arith.constant 0 : i32
    %c0_i32_0 = arith.constant 0 : i32
    %c0_i32_1 = arith.constant 0 : i32
    return %c0_i32, %c0_i32_0 : i32, i32
  }
  func.func @transform_6(%arg0: i32) -> (i32, i32) {
    %c0_i32 = arith.constant 0 : i32
    %c0_i32_0 = arith.constant 0 : i32
    %c0_i32_1 = arith.constant 0 : i32
    return %c0_i32, %c0_i32_0 : i32, i32
  }
  func.func @transform_7(%arg0: i32) -> (i32, i32) {
    %c0_i32 = arith.constant 0 : i32
    %c0_i32_0 = arith.constant 0 : i32
    %c0_i32_1 = arith.constant 0 : i32
    return %c0_i32, %c0_i32_0 : i32, i32
  }
  func.func @transform_8(%arg0: i32) -> (i32, i32) {
    %c0_i32 = arith.constant 0 : i32
    %c0_i32_0 = arith.constant 0 : i32
    %c0_i32_1 = arith.constant 0 : i32
    return %c0_i32, %c0_i32_0 : i32, i32
  }
  func.func @transform_9(%arg0: i32) -> (i32, i32) {
    %c0_i32 = arith.constant 0 : i32
    %c0_i32_0 = arith.constant 0 : i32
    %c0_i32_1 = arith.constant 0 : i32
    return %c0_i32, %c0_i32_0 : i32, i32
  }
  func.func @transform_10(%arg0: i32) -> (i32, i32) {
    %c0_i32 = arith.constant 0 : i32
    %c0_i32_0 = arith.constant 0 : i32
    %c0_i32_1 = arith.constant 0 : i32
    return %c0_i32, %c0_i32_0 : i32, i32
  }
  func.func @transform_11(%arg0: i32) -> (i32, i32) {
    %c0_i32 = arith.constant 0 : i32
    %c0_i32_0 = arith.constant 0 : i32
    %c0_i32_1 = arith.constant 0 : i32
    return %c0_i32, %c0_i32_0 : i32, i32
  }
  func.func @transform_12(%arg0: i32) -> (i32, i32) {
    %c0_i32 = arith.constant 0 : i32
    %c0_i32_0 = arith.constant 0 : i32
    %c0_i32_1 = arith.constant 0 : i32
    return %c0_i32, %c0_i32_0 : i32, i32
  }
  func.func @transform_13(%arg0: i32) -> (i32, i32) {
    %c0_i32 = arith.constant 0 : i32
    %c0_i32_0 = arith.constant 0 : i32
    %c0_i32_1 = arith.constant 0 : i32
    return %c0_i32, %c0_i32_0 : i32, i32
  }
  func.func @transform_14(%arg0: i32) -> (i32, i32) {
    %c0_i32 = arith.constant 0 : i32
    %c0_i32_0 = arith.constant 0 : i32
    return %arg0, %c0_i32 : i32, i32
  }
}

</mosaic_0001>

<bundles_post_ra>
// kernel: tpu_custom_call.1
= control target key start
LH: loop header
LB: loop body
LE: loop exit
PB: predicated region body
PF: predicated region fallthrough
CT: control target
= control target key end

     0   :  { %v1023_v3 = vmov 0.0|0.0   ;;  %vm1024_vm0 = vmmov 0   ;;  %v1025_v6 = vmov 0.0   ;;  %s1309_s0 = inlined_call_operand.vmem [shape: f32[8,32], index: 0, kind: input, shape index: {}]   ;;  %s1310_s1 = inlined_call_operand.vmem [shape: f32[32,64], index: 1, kind: input, shape index: {}]   ;;  %s1311_s2 = inlined_call_operand.vmem [shape: f32[1,64], index: 2, kind: input, shape index: {}]   ;;  %s1312_s3 = inlined_call_operand.vmem [shape: f32[64,32], index: 3, kind: input, shape index: {}]   ;;  %s1313_s4 = inlined_call_operand.vmem [shape: f32[1,32], index: 4, kind: input, shape index: {}]   ;;  %s1314_s5 = inlined_call_operand.vmem [shape: f32[32,96], index: 5, kind: input, shape index: {}]   ;;  %s1315_s6 = inlined_call_operand.vmem [shape: f32[1,96], index: 6, kind: input, shape index: {}]   ;;  %s1316_s7 = inlined_call_operand.vmem [shape: f32[96,48], index: 7, kind: input, shape index: {}]   ;;  %s1317_s8 = inlined_call_operand.vmem [shape: f32[1,48], index: 8, kind: input, shape index: {}]   ;;  %s1318_s9 = inlined_call_operand.vmem [shape: f32[32,6], index: 9, kind: input, shape index: {}]   ;;  %s1319_s10 = inlined_call_operand.vmem [shape: f32[32,32], index: 10, kind: input, shape index: {}]   ;;  %s1320_s11 = inlined_call_operand.vmem [shape: f32[1,32], index: 11, kind: input, shape index: {}]   ;;  %s1321_s12 = inlined_call_operand.vmem [shape: f32[32,16], index: 12, kind: input, shape index: {}]   ;;  %s1322_s13 = inlined_call_operand.vmem [shape: f32[1,16], index: 13, kind: input, shape index: {}]   ;;  %s1323_s14 = inlined_call_operand.hbm [shape: f32[8,16], index: 14, kind: output, shape index: {}]  }
   0x1   :  { %v49_v0 = vld [vmem:[%s1310_s1] sm:$0xff]  ;;  %v50_v1 = vld [vmem:[%s1310_s1 + $0x8] sm:$0xff]  ;;  %v51_v2 = vld [vmem:[%s1310_s1 + $0x10] sm:$0xff]  ;;  %910 = vmatprep.subr.bf16.mxu0 %v1023_v3  ;;  %817 = vmatprep.mubr.msk.f32.mxu0 %vm1024_vm0, %v1025_v6 }
   0x2   :  { %v911_v4 = vpack.c.bf16 %v50_v1, %v49_v0  ;;  %v52_v5 = vld [vmem:[%s1310_s1 + $0x18] sm:$0xff]  ;;  %v135_v7 = vld [vmem:[%s1312_s3] sm:$0xff]  ;;  %916 = vmatprep.subr.bf16.mxu1 %v1023_v3  ;;  %v136_v8 = vld [vmem:[%s1312_s3 + $0x8] sm:$0xff]  ;;  %836 = vmatprep.mubr.msk.f32.mxu1 %vm1024_vm0, %v1025_v6 }
   0x3   :  { %v137_v9 = vld [vmem:[%s1312_s3 + $0x10] sm:$0xff]  ;;  %v138_v10 = vld [vmem:[%s1312_s3 + $0x18] sm:$0xff]  ;;  %v914_v11 = vpack.c.bf16 %v52_v5, %v51_v2  ;;  %v917_v12 = vpack.c.bf16 %v136_v8, %v135_v7 }
   0x4   :  { %912 = vmatpush3.bf16.msra.mxu0 %v911_v4 }
   0x5   :  { %913 = vmatprep.subr.bf16.mxu0 %v1023_v3 }
   0x6   :  { %19 = vsyncpa [#allocation3], 0  ;;  %918 = vmatpush3.bf16.msra.mxu1 %v917_v12  ;;  %v920_v13 = vpack.c.bf16 %v138_v10, %v137_v9  ;;  %v139_v14 = vld [vmem:[%s1312_s3 + $0x20] sm:$0xff]  ;;  %v140_v15 = vld [vmem:[%s1312_s3 + $0x28] sm:$0xff]  ;;  %vm60_vm1 = vcmask 261120   ;;  %vm150_vm2 = vcmask 523264  }
   0x7   :  { %919 = vmatprep.subr.bf16.mxu1 %v1023_v3  ;;  %v48_v16 = vld [vmem:[%s1309_s0] sm:$0xff]  ;;  %v923_v17 = vpack.c.bf16 %v140_v15, %v139_v14  ;;  %v141_v18 = vld [vmem:[%s1312_s3 + $0x30] sm:$0xff]  ;;  %v142_v19 = vld [vmem:[%s1312_s3 + $0x38] sm:$0xff]  ;;  %vm516_vm3 = vcmask 48152   ;;  %vm478_vm4 = vcmask 23552   ;;  %vm329_vm5 = vcmask 785408  }
   0x8   :  { %915 = vmatpush3.bf16.msra.mxu0 %v914_v11  ;;  %v926_v20 = vpack.c.bf16 %v142_v19, %v141_v18  ;;  %v225_v21 = vld [vmem:[%s1314_s5] sm:$0xff]  ;;  %v226_v22 = vld [vmem:[%s1314_s5 + $0x8] sm:$0xff]  ;;  %v227_v32 = vld [vmem:[%s1314_s5 + $0x10] sm:$0xff]  ;;  %s1033_s1 = smov 112   ;;  %s1034_s28 = smov 96   ;;  %vm562_vm6 = vcmask 130048  }
   0x9   :  { %928 = vmatprep.subr.bf16.mxu0 %v1023_v3  ;;  %v929_v23 = vpack.c.bf16 %v226_v22, %v225_v21  ;;  %v749_v24 = vld [vmem:[%s1311_s2] ss:$0 sm:$0xff]  ;;  %v405_v26 = vld [vmem:[%s1318_s9 + $0x8] sm:$0xff]  ;;  %v228_v33 = vld [vmem:[%s1314_s5 + $0x18] sm:$0xff]  ;;  %v1027_v21 = vmov 5   ;;  %v1028_v22 = vmov 4  }
   0xa   :  { %921 = vmatpush3.bf16.msra.mxu1 %v920_v13  ;;  %v404_v25 = vld [vmem:[%s1318_s9] sm:$0xff]  ;;  %v406_v34 = vld [vmem:[%s1318_s9 + $0x10] sm:$0xff]  ;;  %v932_v35 = vpack.c.bf16 %v228_v33, %v227_v32  ;;  %v407_v36 = vld [vmem:[%s1318_s9 + $0x18] sm:$0xff]  ;;  %985 = vset.pattern.permute.xlu0 %v1027_v21  ;;  %v1032_v32 = vmov 3   ;;  %s1036_s22 = smov [#allocation2]  }
   0xb   :  { %818 = vmatmul.mubr.msk.f32.vlgmr.msra.gmra.mrb[0].mxu0 %vm60_vm1, %v48_v16  ;;  %922 = vmatprep.subr.bf16.mxu1 %v1023_v3  ;;  %v953_v30 = vpack.c.bf16 %v405_v26, %v404_v25  ;;  %v956_v37 = vpack.c.bf16 %v407_v36, %v406_v34  ;;  %v751_v38 = vld [vmem:[%s1313_s4] ss:$0 sm:$0xff]  ;;  %v311_v40 = vld [vmem:[%s1316_s7 + $0x8] sm:$0xff]  ;;  %v312_v46 = vld [vmem:[%s1316_s7 + $0x10] sm:$0xff] }
   0xc   :  { %847 = vmatprep.mubr.msk.f32.mxu0 %vm1024_vm0, %v1025_v6  ;;  %930 = vmatpush3.bf16.msra.mxu0 %v929_v23  ;;  %v310_v39 = vld [vmem:[%s1316_s7] sm:$0xff]  ;;  %v313_v47 = vld [vmem:[%s1316_s7 + $0x18] sm:$0xff]  ;;  %v315_v50 = vld [vmem:[%s1316_s7 + $0x28] sm:$0xff] }
   0xd   :  { %931 = vmatprep.subr.bf16.mxu0 %v1023_v3  ;;  %v935_v44 = vpack.c.bf16 %v311_v40, %v310_v39  ;;  %v938_v48 = vpack.c.bf16 %v313_v47, %v312_v46  ;;  %v314_v49 = vld [vmem:[%s1316_s7 + $0x20] sm:$0xff]  ;;  %v316_v52 = vld [vmem:[%s1316_s7 + $0x30] sm:$0xff]  ;;  %v317_v53 = vld [vmem:[%s1316_s7 + $0x38] sm:$0xff]  ;;  %984 = vset.pattern.permute.xlu1 %v1028_v22 }
   0xe   :  { %924 = vmatpush3.bf16.msra.mxu1 %v923_v17  ;;  %v941_v51 = vpack.c.bf16 %v315_v50, %v314_v49  ;;  %v944_v54 = vpack.c.bf16 %v317_v53, %v316_v52  ;;  %v318_v55 = vld [vmem:[%s1316_s7 + $0x40] sm:$0xff]  ;;  %v319_v56 = vld [vmem:[%s1316_s7 + $0x48] sm:$0xff]  ;;  %v320_v58 = vld [vmem:[%s1316_s7 + $0x50] sm:$0xff] }
   0xf   :  { %925 = vmatprep.subr.bf16.mxu1 %v1023_v3  ;;  %v947_v57 = vpack.c.bf16 %v319_v56, %v318_v55  ;;  %v321_v59 = vld [vmem:[%s1316_s7 + $0x58] sm:$0xff]  ;;  %v753_v61 = vld [vmem:[%s1315_s6] ss:$0 sm:$0xff]  ;;  %s1026_s6 = smov 125   ;;  %v565_v40 = vld [vmem:[%s1319_s10 + $0x8] sm:$0xff] }
  0x10   :  { %933 = vmatpush3.bf16.msra.mxu0 %v932_v35  ;;  %v950_v60 = vpack.c.bf16 %v321_v59, %v320_v58  ;;  %v755_v33 = vld [vmem:[%s1317_s8] ss:$0 sm:$0xff] }
  0x11   :  { %934 = vmatprep.subr.bf16.mxu0 %v1023_v3  ;;  %v564_v39 = vld [vmem:[%s1319_s10] sm:$0xff] }
  0x12   :  { %927 = vmatpush3.bf16.msra.mxu1 %v926_v20 }
  0x13   :  { %952 = vmatprep.subr.bf16.mxu1 %v1023_v3 }
  0xde   :  { %v130_v27 = vpop.f32.mrb[0].mxu0 }
  0xdf   :  { %v131_v28 = vadd.f32 %v749_v24, %v130_v27  ;;  %v819_v29 = vpop.f32.mrb[1].mxu0 }
  0xe0   :  { %v1029_v29 = vmov 2  }
  0xe1   :  { %v134_v31 = vmax.f32 %v131_v28, 0.0 }
  0xe3   :  { %837 = vmatmul.mubr.msk.f32.vlgmr.msra.gmra.mrb[0].mxu1 %vm150_vm2, %v134_v31  ;;  %v1031_v31 = vmov 0  }
  0xe4   :  { %954 = vmatpush3.bf16.msra.mxu1 %v953_v30  ;;  %885 = vmatprep.mubr.msk.f32.mxu1 %vm1024_vm0, %v1025_v6  ;;  %v1030_v30 = vmov 1  }
  0xe5   :  { %955 = vmatprep.subr.bf16.mxu1 %v1023_v3 }
  0xe8   :  { %957 = vmatpush3.bf16.msra.mxu1 %v956_v37 }
  0xe9   :  { %958 = vmatprep.subr.bf16.mxu1 %v1023_v3 }
 0x1b6   :  { %v220_v41 = vpop.f32.mrb[0].mxu1 }
 0x1b7   :  { %v221_v42 = vadd.f32 %v751_v38, %v220_v41  ;;  %v838_v43 = vpop.f32.mrb[1].mxu1  ;;  %v566_v41 = vld [vmem:[%s1319_s10 + $0x10] sm:$0xff] }
 0x1b8   :  { %v567_v43 = vld [vmem:[%s1319_s10 + $0x18] sm:$0xff]  ;;  %s1035_s10 = smov 16  }
 0x1b9   :  { %v224_v45 = vmax.f32 %v221_v42, 0.0  ;;  %v959_v42 = vpack.c.bf16 %v565_v40, %v564_v39 }
 0x1bb   :  { %848 = vmatmul.mubr.msk.f32.vlgmr.msra.gmra.mrb[2].mxu0 %vm60_vm1, %v224_v45  ;;  %886 = vmatmul.mubr.msk.f32.vlgmr.msra.gmra.mrb[2].mxu1 %vm60_vm1, %v224_v45  ;;  %v962_v45 = vpack.c.bf16 %v567_v43, %v566_v41 }
 0x1bc   :  { %936 = vmatpush3.bf16.msra.mxu0 %v935_v44  ;;  %874 = vmatprep.mubr.msk.f32.mxu0 %vm1024_vm0, %v1025_v6 }
 0x1bd   :  { %937 = vmatprep.subr.bf16.mxu0 %v1023_v3  ;;  %896 = vmatprep.mubr.msk.f32.mxu1 %vm1024_vm0, %v1025_v6 }
 0x1be   :  { %960 = vmatpush3.bf16.msra.mxu1 %v959_v42 }
 0x1bf   :  { %961 = vmatprep.subr.bf16.mxu1 %v1023_v3 }
 0x1c0   :  { %939 = vmatpush3.bf16.msra.mxu0 %v938_v48 }
 0x1c1   :  { %940 = vmatprep.subr.bf16.mxu0 %v1023_v3 }
 0x1c2   :  { %963 = vmatpush3.bf16.msra.mxu1 %v962_v45 }
 0x1c3   :  { %964 = vmatprep.subr.bf16.mxu1 %v1023_v3 }
 0x1c4   :  { %942 = vmatpush3.bf16.msra.mxu0 %v941_v51 }
 0x1c5   :  { %943 = vmatprep.subr.bf16.mxu0 %v1023_v3 }
 0x1c8   :  { %945 = vmatpush3.bf16.msra.mxu0 %v944_v54 }
 0x1c9   :  { %946 = vmatprep.subr.bf16.mxu0 %v1023_v3 }
 0x1cc   :  { %948 = vmatpush3.bf16.msra.mxu0 %v947_v57 }
 0x1cd   :  { %949 = vmatprep.subr.bf16.mxu0 %v1023_v3 }
 0x1d0   :  { %951 = vmatpush3.bf16.msra.mxu0 %v950_v60  ;;  %v649_v60 = vld [vmem:[%s1321_s12] sm:$0xff] }
 0x28e   :  { %v305_v62 = vpop.f32.mrb[2].mxu0  ;;  %v474_v63 = vpop.f32.mrb[2].mxu1 }
 0x28f   :  { %v306_v0 = vadd.f32 %v753_v61, %v305_v62  ;;  %v849_v1 = vpop.f32.mrb[3].mxu0  ;;  %v887_v2 = vpop.f32.mrb[3].mxu1  ;;  %v517_v4 = vsel %vm516_vm3, %v474_v63, -inf  ;;  %v479_v5 = vsel %vm478_vm4, %v474_v63, -inf  ;;  %v650_v61 = vld [vmem:[%s1321_s12 + $0x8] sm:$0xff] }
 0x290   :  { %518 = vmax.xlane.f32.xlu0 %v517_v4  ;;  %480 = vmax.xlane.f32.xlu1 %v479_v5  ;;  %v651_v4 = vld [vmem:[%s1321_s12 + $0x10] sm:$0xff]  ;;  %v652_v5 = vld [vmem:[%s1321_s12 + $0x18] sm:$0xff] }
 0x291   :  { %v309_v7 = vmax.f32 %v306_v0, 0.0  ;;  %v965_v0 = vpack.c.bf16 %v650_v61, %v649_v60 }
 0x293   :  { %875 = vmatmul.mubr.msk.f32.vlgmr.msra.gmra.mrb[4].mxu0 %vm329_vm5, %v309_v7  ;;  %v968_v7 = vpack.c.bf16 %v652_v5, %v651_v4 }
 0x31d   :  { %v519_v8 = vpop.xlane.xlu0 %518  ;;  %v481_v14 = vpop.xlane.xlu1 %480 }
 0x31e   :  { %v520_v9 = vsub.f32 %v474_v63, %v519_v8  ;;  %v482_v15 = vsub.f32 %v474_v63, %v481_v14  ;;  %v758_v8 = vld [vmem:[%s1320_s11] ss:$0 sm:$0xff] }
 0x320   :  { %v521_v10 = vmul.f32 1.442695, %v520_v9  ;;  %v483_v16 = vmul.f32 1.442695, %v482_v15 }
 0x322   :  { %991 = vpow2.f32 %v521_v10 }
 0x323   :  { %993 = vpow2.f32 %v483_v16 }
 0x32c   :  { %v992_v11 = vpop.eup %991 }
 0x32d   :  { %524 = vrot.lane.b32.xlu0 %v992_v11, %s1026_s6  ;;  %v994_v19 = vpop.eup %993  ;;  %s741_s6 = sshll.u32 %s1036_s22, 4  ;;  %s742_s6 = int_to_ptr.vmem [resolvable:$true] %s741_s6 }
 0x32e   :  { %v485_v20 = vsel %vm478_vm4, %v994_v19, 0.0  ;;  %s999_s11 = scalar_lea.vmem %s742_s6, 128  ;;  %p1004_p1 = scmp.lt.s32.totalorder %s742_s6, %s742_s6 }
 0x32f   :  { %p1000_p0 = scmp.ne.s32.totalorder %s742_s6, %s999_s11  ;;  %p1005_p2 = scmp.lt.s32.totalorder %s999_s11, %s999_s11 }
 0x331   :  { %p1006_p3 = por %p1005_p2, %p1004_p1 }
 0x333   :  { %p1007_p4 = pnand %p1006_p3, %p1000_p0 }
 0x366   :  { %v399_v12 = vpop.f32.mrb[4].mxu0 }
 0x367   :  { %v876_v13 = vpop.f32.mrb[5].mxu0  ;;  %v400_v34 = vadd.f32 %v755_v33, %v399_v12 }
 0x369   :  { %v403_v35 = vmax.f32 %v400_v34, 0.0 }
 0x39f   :  { %v525_v17 = vpop.permute.xlu0 %524 }
 0x3a0   :  { %v527_v18 = vsel %vm478_vm4, %v525_v17, 0.0 }
 0x3a1   :  { %528 = vadd.xlane.f32.xlu1 %v527_v18 }
 0x3a5   :  { %486 = vadd.xlane.f32.xlu1 %v485_v20 }
 0x42e   :  { %v529_v23 = vpop.xlane.xlu1 %528 }
 0x42f   :  { %995 = vrcp.f32 %v529_v23 }
 0x432   :  { %v487_v24 = vpop.xlane.xlu1 %486 }
 0x433   :  { %997 = vrcp.f32 %v487_v24 }
 0x439   :  { %v996_v25 = vpop.eup %995 }
 0x43a   :  { %v531_v26 = vmul.f32 %v996_v25, %v992_v11 }
 0x43c   :  { %549 = vperm.xlu0 %985, %v531_v26   ;;  %539 = vperm.xlu1 %984, %v531_v26  }
 0x43d   :  { %v998_v27 = vpop.eup %997 }
 0x43e   :  { %v489_v28 = vmul.f32 %v998_v27, %v994_v19 }
 0x440   :  { %988 = vset.pattern.permute.xlu0 %v1029_v29  ;;  %986 = vset.pattern.permute.xlu1 %v1030_v30 }
 0x441   :  { %507 = vperm.xlu0 %988, %v489_v28   ;;  %497 = vperm.xlu1 %986, %v489_v28  }
 0x445   :  { %989 = vset.pattern.permute.xlu0 %v1031_v31  ;;  %987 = vset.pattern.permute.xlu1 %v1032_v32 }
 0x446   :  { %492 = vperm.xlu0 %989, %v489_v28   ;;  %534 = vperm.xlu1 %987, %v531_v26  }
 0x44a   :  { %990 = vset.pattern.permute.xlu0 %v1027_v21 }
 0x4bb   :  { %v540_v36 = vpop.permute.xlu1 %539  ;;  %v550_v38 = vpop.permute.xlu0 %549 }
 0x4bc   :  { %v542_v37 = vmul.f32 %v540_v36, %v403_v35  ;;  %v552_v44 = vmul.f32 %v550_v38, %v403_v35 }
 0x4be   :  { %544 = vrot.lane.b32.xlu1 %v542_v37, %s1033_s1 }
 0x4c0   :  { %v498_v46 = vpop.permute.xlu1 %497  ;;  %v508_v48 = vpop.permute.xlu0 %507 }
 0x4c1   :  { %v500_v47 = vmul.f32 %v498_v46, %v403_v35  ;;  %v510_v49 = vmul.f32 %v508_v48, %v403_v35 }
 0x4c2   :  { %554 = vrot.lane.b32.xlu1 %v552_v44, %s1034_s28 }
 0x4c5   :  { %v535_v50 = vpop.permute.xlu1 %534  ;;  %v493_v57 = vpop.permute.xlu0 %492 }
 0x4c6   :  { %502 = vrot.lane.b32.xlu1 %v500_v47, %s1033_s1  ;;  %v537_v52 = vmul.f32 %v535_v50, %v403_v35  ;;  %v495_v58 = vmul.f32 %v493_v57, %v403_v35 }
 0x4ca   :  { %512 = vrot.lane.b32.xlu1 %v510_v49, %s1034_s28 }
 0x530   :  { %v545_v51 = vpop.permute.xlu1 %544 }
 0x531   :  { %v547_v53 = vadd.f32 %v545_v51, %v537_v52 }
 0x534   :  { %v555_v54 = vpop.permute.xlu1 %554 }
 0x535   :  { %v557_v55 = vadd.f32 %v555_v54, %v547_v53 }
 0x537   :  { %559 = vrot.lane.b32.xlu0 %v557_v55, %s1035_s10 }
 0x538   :  { %v503_v56 = vpop.permute.xlu1 %502 }
 0x539   :  { %v505_v62 = vadd.f32 %v503_v56, %v495_v58 }
 0x53c   :  { %v513_v59 = vpop.permute.xlu1 %512 }
 0x53d   :  { %v515_v63 = vadd.f32 %v513_v59, %v505_v62 }
 0x5a9   :  { %v560_v1 = vpop.permute.xlu0 %559 }
 0x5aa   :  { %v563_v2 = vsel %vm562_vm6, %v515_v63, %v560_v1 }
 0x5ab   :  { %897 = vmatmul.mubr.msk.f32.vlgmr.msra.gmra.mrb[4].mxu1 %vm60_vm1, %v563_v2 }
 0x5ac   :  { %966 = vmatpush3.bf16.msra.mxu1 %v965_v0  ;;  %907 = vmatprep.mubr.msk.f32.mxu1 %vm1024_vm0, %v1025_v6 }
 0x5ad   :  { %967 = vmatprep.subr.bf16.mxu1 %v1023_v3  ;;  %v760_v3 = vld [vmem:[%s1322_s13] ss:$0 sm:$0xff] }
 0x5b0   :  { %969 = vmatpush3.bf16.msra.mxu1 %v968_v7 }
 0x67e   :  { %v644_v9 = vpop.f32.mrb[4].mxu1 }
 0x67f   :  { %v645_v10 = vadd.f32 %v758_v8, %v644_v9  ;;  %v898_v11 = vpop.f32.mrb[5].mxu1 }
 0x681   :  { %v648_v6 = vmax.f32 %v645_v10, 0.0 }
 0x683   :  { %908 = vmatmul.mubr.msk.f32.vlgmr.msra.gmra.mrb[6].mxu1 %vm60_vm1, %v648_v6 }
 0x756   :  { %v729_v12 = vpop.f32.mrb[6].mxu1 }
 0x757   :  { %v730_v13 = vadd.f32 %v760_v3, %v729_v12  ;;  %v909_v14 = vpop.f32.mrb[7].mxu1 }
 0x759   :  { %v733_v15 = vmax.f32 %v730_v13, 0.0 }
 0x75b   :  { %734 = vst.msk [vmem:[#allocation2] sm:$0xff] %vm562_vm6, %v733_v15 }
 0x75c   :  { %1010 = shalt.err (!%p1007_p4)
}
 0x75d   :  { %s1011_s13 = scalar_lea.hbm %s1323_s14, 128 }
 0x75e   :  { %p1012_p5 = scmp.ne.s32.totalorder %s1323_s14, %s1011_s13  ;;  %p1015_p6 = scmp.lt.u32.totalorder %s1011_s13, %s1323_s14 }
 0x760   :  { %p1017_p7 = pnand %p1015_p6, %p1012_p5 }
 0x762   :  { %1020 = shalt.err (!%p1017_p7)
}
 0x763   :  { %744 = dma.vmem_to_hbm [thread:$0]  %s742_s6, 128, %s1323_s14, [#allocation3]  }
 0x764   :  { %1021 = dma.done.wait [#allocation3], 128  }
 0x765   :  { %1022 = vsyncadd [#allocation3], 4294967168 }
 0x766   :  { %748 = vsyncpa [#allocation3], 1 }

</bundles_post_ra>
